<compile_context>
chip_gen: v6e
topology: v6e:2x2x1
jax: 0.10.0
libtpu: 0.0.40
codegen_flags: <defaults>
</compile_context>

<pallas_src>
import functools

import jax
import jax.numpy as jnp
from jax.experimental import pallas as pl
from jax.experimental.pallas import tpu as pltpu


def _mlp_kernel(x_ref, w1_ref, b1_ref, w2_ref, b2_ref, w3_ref, b3_ref, o_ref):
    # x_ref: (TM, 2) tile of flattened waypoints (rows on sublanes).
    x = x_ref[...].astype(jnp.float32)
    w1 = w1_ref[...].astype(jnp.float32)

    # K=2 first layer as two VALU FMAs (skip the MXU for a degenerate matmul).
    h1 = x[:, 0:1] * w1[0:1, :] + x[:, 1:2] * w1[1:2, :] + b1_ref[...]
    h1 = jnp.maximum(h1, 0.0)                                   # ReLU

    # Matmuls run at the weights' dtype (f32 by default, bf16 if opted in);
    # accumulation is always f32 via preferred_element_type.
    h2 = jnp.dot(h1.astype(w2_ref.dtype), w2_ref[...],
                 preferred_element_type=jnp.float32) + b2_ref[...]
    h2 = jnp.maximum(h2, 0.0)                                   # ReLU

    out = jnp.dot(h2.astype(w3_ref.dtype), w3_ref[...],
                  preferred_element_type=jnp.float32) + b3_ref[...]
    o_ref[...] = out.astype(o_ref.dtype)


def prepare_params(w1, b1, w2, b2, w3, b3, compute_dtype=jnp.float32):
    """One-time parameter prep (hoisted out of the per-call path).

    Reshapes biases to (1, H) for in-kernel row broadcast and optionally casts
    the MXU-facing weights (W2, W3) to a reduced compute dtype (e.g. bf16).
    W1 and all biases stay f32 (VPU path / f32 accumulation).
    """
    return (
        w1.astype(jnp.float32),
        b1.reshape(1, -1).astype(jnp.float32),
        w2.astype(compute_dtype),
        b2.reshape(1, -1).astype(jnp.float32),
        w3.astype(compute_dtype),
        b3.reshape(1, -1).astype(jnp.float32),
    )


@functools.partial(jax.jit,
                   static_argnames=("tm", "out_dtype", "min_rows_for_pallas"))
def waypoint_input_adaptor(x, w1, b1r, w2, b2r, w3, b3r, *,
                           tm=2048, out_dtype=None, min_rows_for_pallas=0):
    """x: [B, N, 2] -> [B, N, token_size].  Params come from prepare_params()."""
    B, N, F = x.shape
    assert F == 2
    token_size = w3.shape[1]
    M = B * N
    out_dtype = x.dtype if out_dtype is None else out_dtype

    # Optional policy: for very small M the pallas_call is pure overhead
    # (weight DMA + dispatch for a handful of rows) -> plain fused XLA MLP.
    if M < min_rows_for_pallas:
        h = jax.nn.relu(x.astype(jnp.float32) @ w1 + b1r[0])
        h = jax.nn.relu(h.astype(w2.dtype) @ w2 + b2r[0])
        out = h.astype(w3.dtype) @ w3 + b3r[0]
        return out.astype(out_dtype)

    # --- Row tiling -----------------------------------------------------------
    # Small M: single 8-aligned tile.  Larger M: cap the tile at ceil(M/2)
    # (rounded to 8) so grid >= 2 and both TensorCores participate on v7x;
    # default tile of 2048 amortizes per-step overhead for large M.
    M8 = pl.cdiv(M, 8) * 8
    if M8 <= 64:
        tm_eff = M8
    else:
        half = pl.cdiv(pl.cdiv(M, 2), 8) * 8
        tm_eff = min(tm, half)
    Mp = pl.cdiv(M, tm_eff) * tm_eff

    x2d = x.reshape(M, F)
    if Mp != M:
        x2d = jnp.pad(x2d, ((0, Mp - M), (0, 0)))

    grid = (Mp // tm_eff,)

    H1 = w1.shape[1]
    H2 = w2.shape[1]
    out_itemsize = jnp.dtype(out_dtype).itemsize
    flops = 2 * Mp * (F * H1 + H1 * H2 + H2 * token_size)
    bytes_accessed = (
        Mp * F * x.dtype.itemsize
        + Mp * token_size * out_itemsize
        + w1.size * 4 + b1r.size * 4
        + w2.size * w2.dtype.itemsize + b2r.size * 4
        + w3.size * w3.dtype.itemsize + b3r.size * 4
    )

    out = pl.pallas_call(
        _mlp_kernel,
        out_shape=jax.ShapeDtypeStruct((Mp, token_size), out_dtype),
        grid_spec=pltpu.PrefetchScalarGridSpec(
            num_scalar_prefetch=0,
            grid=grid,
            in_specs=[
                pl.BlockSpec((tm_eff, F), lambda i: (i, 0)),      # x tile
                pl.BlockSpec(w1.shape, lambda i: (0, 0)),          # W1 (2, H1)
                pl.BlockSpec(b1r.shape, lambda i: (0, 0)),         # b1 (1, H1)
                pl.BlockSpec(w2.shape, lambda i: (0, 0)),          # W2 (H1, H2)
                pl.BlockSpec(b2r.shape, lambda i: (0, 0)),         # b2 (1, H2)
                pl.BlockSpec(w3.shape, lambda i: (0, 0)),          # W3 (H2, T)
                pl.BlockSpec(b3r.shape, lambda i: (0, 0)),         # b3 (1, T)
            ],
            # Exactly token_size columns (full last dim): no HBM column padding
            # and no post-kernel column-slice copy.
            out_specs=pl.BlockSpec((tm_eff, token_size), lambda i: (i, 0)),
        ),
        compiler_params=pltpu.CompilerParams(
            dimension_semantics=("parallel",)),
        cost_estimate=pl.CostEstimate(
            flops=flops, transcendentals=0, bytes_accessed=bytes_accessed),
    )(x2d, w1, b1r, w2, b2r, w3, b3r)

    if Mp != M:
        out = out[:M]                       # row slice only when rows were padded
    return out.reshape(B, N, token_size)


def init_params(key, token_size=258, hidden_size=64, hidden_size2=128,
                dtype=jnp.float32):
    """Deterministic init mimicking nn.Linear defaults (U[-1/sqrt(fan_in), +])."""
    ks = jax.random.split(key, 6)

    def lin(kw, kb, fan_in, fan_out):
        bound = 1.0 / jnp.sqrt(fan_in)
        w = jax.random.uniform(kw, (fan_in, fan_out), dtype, -bound, bound)
        b = jax.random.uniform(kb, (fan_out,), dtype, -bound, bound)
        return w, b

    w1, b1 = lin(ks[0], ks[1], 2, hidden_size)
    w2, b2 = lin(ks[2], ks[3], hidden_size, hidden_size2)
    w3, b3 = lin(ks[4], ks[5], hidden_size2, token_size)
    return w1, b1, w2, b2, w3, b3


def reference_forward(x, w1, b1, w2, b2, w3, b3):
    h = jax.nn.relu(x @ w1 + b1)
    h = jax.nn.relu(h @ w2 + b2)
    return h @ w3 + b3


if __name__ == "__main__":
    key = jax.random.PRNGKey(0)
    k_x, k_p = jax.random.split(key)

    # Small shapes consistent with the module: x is [B, N, 2].
    B, N = 2, 8
    token_size, hidden_size, hidden_size2 = 258, 64, 128

    x = jax.random.normal(k_x, (B, N, 2), dtype=jnp.float32)
    raw = init_params(k_p, token_size, hidden_size, hidden_size2)
    params = prepare_params(*raw)           # one-time prep (hoisted out of call)

    out = waypoint_input_adaptor(x, *params)
    out = jax.block_until_ready(out)
    assert out.shape == (B, N, token_size), out.shape

    ref = reference_forward(x, *raw)
    assert jnp.allclose(out, ref, atol=1e-4, rtol=1e-4), "mismatch vs reference"

    # Multi-tile path: M=1280 -> tm_eff=640, grid=(2,) (both TCs on v7x).
    B2, N2 = 16, 80
    x_big = jax.random.normal(k_x, (B2, N2, 2), dtype=jnp.float32)
    out_big = jax.block_until_ready(waypoint_input_adaptor(x_big, *params))
    ref_big = reference_forward(x_big, *raw)
    assert jnp.allclose(out_big, ref_big, atol=1e-4, rtol=1e-4), "mismatch (big)"

    # Ragged rows: M=21 -> padded to 24, trailing rows sliced off.
    B3, N3 = 3, 7
    x_rag = jax.random.normal(k_x, (B3, N3, 2), dtype=jnp.float32)
    out_rag = jax.block_until_ready(waypoint_input_adaptor(x_rag, *params))
    ref_rag = reference_forward(x_rag, *raw)
    assert jnp.allclose(out_rag, ref_rag, atol=1e-4, rtol=1e-4), "mismatch (ragged)"

    print("KERNEL_OK")
</pallas_src>

<mosaic_0001>
module attributes {stable_mosaic.version = 11 : i64} {
  func.func @_mlp_kernel(%arg0: i32, %arg1: memref<16x2xf32, #tpu.memory_space<vmem>>, %arg2: memref<2x64xf32, #tpu.memory_space<vmem>>, %arg3: memref<1x64xf32, #tpu.memory_space<vmem>>, %arg4: memref<64x128xf32, #tpu.memory_space<vmem>>, %arg5: memref<1x128xf32, #tpu.memory_space<vmem>>, %arg6: memref<128x258xf32, #tpu.memory_space<vmem>>, %arg7: memref<1x258xf32, #tpu.memory_space<vmem>>, %arg8: memref<16x258xf32, #tpu.memory_space<vmem>>) attributes {dimension_semantics = [#tpu.dimension_semantics<parallel>], iteration_bounds = array<i64: 1>, scalar_prefetch = 0 : i64, scratch_operands = 0 : i64, tpu.core_type = #tpu.core_type<tc>, window_params = [{transform_indices = @transform_0, window_bounds = array<i64: 16, 2>}, {pipeline_mode = #tpu.pipeline_mode<synchronous>, transform_indices = @transform_1, window_bounds = array<i64: 2, 64>}, {pipeline_mode = #tpu.pipeline_mode<synchronous>, transform_indices = @transform_2, window_bounds = array<i64: 1, 64>}, {pipeline_mode = #tpu.pipeline_mode<synchronous>, transform_indices = @transform_3, window_bounds = array<i64: 64, 128>}, {pipeline_mode = #tpu.pipeline_mode<synchronous>, transform_indices = @transform_4, window_bounds = array<i64: 1, 128>}, {pipeline_mode = #tpu.pipeline_mode<synchronous>, transform_indices = @transform_5, window_bounds = array<i64: 128, 258>}, {pipeline_mode = #tpu.pipeline_mode<synchronous>, transform_indices = @transform_6, window_bounds = array<i64: 1, 258>}, {transform_indices = @transform_7, window_bounds = array<i64: 16, 258>}]} {
    %c0 = arith.constant 0 : index
    %c0_0 = arith.constant 0 : index
    %0 = vector.load %arg1[%c0, %c0_0] : memref<16x2xf32, #tpu.memory_space<vmem>>, vector<16x2xf32>
    %c0_1 = arith.constant 0 : index
    %c0_2 = arith.constant 0 : index
    %1 = vector.load %arg2[%c0_1, %c0_2] : memref<2x64xf32, #tpu.memory_space<vmem>>, vector<2x64xf32>
    %2 = vector.extract_strided_slice %0 {offsets = [0, 0], sizes = [16, 1], strides = [1, 1]} : vector<16x2xf32> to vector<16x1xf32>
    %3 = vector.extract_strided_slice %1 {offsets = [0, 0], sizes = [1, 64], strides = [1, 1]} : vector<2x64xf32> to vector<1x64xf32>
    %4 = vector.broadcast %2 : vector<16x1xf32> to vector<16x64xf32>
    %5 = vector.broadcast %3 : vector<1x64xf32> to vector<16x64xf32>
    %6 = arith.mulf %4, %5 : vector<16x64xf32>
    %7 = vector.extract_strided_slice %0 {offsets = [0, 1], sizes = [16, 1], strides = [1, 1]} : vector<16x2xf32> to vector<16x1xf32>
    %8 = vector.extract_strided_slice %1 {offsets = [1, 0], sizes = [1, 64], strides = [1, 1]} : vector<2x64xf32> to vector<1x64xf32>
    %9 = vector.broadcast %7 : vector<16x1xf32> to vector<16x64xf32>
    %10 = vector.broadcast %8 : vector<1x64xf32> to vector<16x64xf32>
    %11 = arith.mulf %9, %10 : vector<16x64xf32>
    %12 = arith.addf %6, %11 : vector<16x64xf32>
    %c0_3 = arith.constant 0 : index
    %c0_4 = arith.constant 0 : index
    %13 = vector.load %arg3[%c0_3, %c0_4] : memref<1x64xf32, #tpu.memory_space<vmem>>, vector<1x64xf32>
    %14 = vector.broadcast %13 : vector<1x64xf32> to vector<16x64xf32>
    %15 = arith.addf %12, %14 : vector<16x64xf32>
    %cst = arith.constant 0.000000e+00 : f32
    %16 = vector.broadcast %cst : f32 to vector<16x64xf32>
    %17 = arith.maximumf %15, %16 : vector<16x64xf32>
    %c0_5 = arith.constant 0 : index
    %c0_6 = arith.constant 0 : index
    %18 = vector.load %arg4[%c0_5, %c0_6] : memref<64x128xf32, #tpu.memory_space<vmem>>, vector<64x128xf32>
    %cst_7 = arith.constant dense<0.000000e+00> : vector<16x128xf32>
    %19 = tpu.matmul %17, %18, %cst_7 {dimension_numbers = #tpu.dot_dimension_numbers<[1], [0], [0], [1], [0, 0, 1, 1], [], []>} : vector<16x64xf32>, vector<64x128xf32>, vector<16x128xf32> -> vector<16x128xf32>
    %c0_8 = arith.constant 0 : index
    %c0_9 = arith.constant 0 : index
    %20 = vector.load %arg5[%c0_8, %c0_9] : memref<1x128xf32, #tpu.memory_space<vmem>>, vector<1x128xf32>
    %21 = vector.broadcast %20 : vector<1x128xf32> to vector<16x128xf32>
    %22 = arith.addf %19, %21 : vector<16x128xf32>
    %cst_10 = arith.constant 0.000000e+00 : f32
    %23 = vector.broadcast %cst_10 : f32 to vector<16x128xf32>
    %24 = arith.maximumf %22, %23 : vector<16x128xf32>
    %c0_11 = arith.constant 0 : index
    %c0_12 = arith.constant 0 : index
    %25 = vector.load %arg6[%c0_11, %c0_12] : memref<128x258xf32, #tpu.memory_space<vmem>>, vector<128x258xf32>
    %cst_13 = arith.constant dense<0.000000e+00> : vector<16x258xf32>
    %26 = tpu.matmul %24, %25, %cst_13 {dimension_numbers = #tpu.dot_dimension_numbers<[1], [0], [0], [1], [0, 0, 1, 1], [], []>} : vector<16x128xf32>, vector<128x258xf32>, vector<16x258xf32> -> vector<16x258xf32>
    %c0_14 = arith.constant 0 : index
    %c0_15 = arith.constant 0 : index
    %27 = vector.load %arg7[%c0_14, %c0_15] : memref<1x258xf32, #tpu.memory_space<vmem>>, vector<1x258xf32>
    %28 = vector.broadcast %27 : vector<1x258xf32> to vector<16x258xf32>
    %29 = arith.addf %26, %28 : vector<16x258xf32>
    %c0_16 = arith.constant 0 : index
    %c0_17 = arith.constant 0 : index
    %30 = vector.load %arg8[%c0_16, %c0_17] : memref<16x258xf32, #tpu.memory_space<vmem>>, vector<16x258xf32>
    tpu.vector_store %arg8[%c0_16, %c0_17], %29 {strides = array<i32>} : memref<16x258xf32, #tpu.memory_space<vmem>>, vector<16x258xf32>,
    return
  }
  func.func @transform_0(%arg0: i32) -> (i32, i32) {
    %c0_i32 = arith.constant 0 : i32
    %c0_i32_0 = arith.constant 0 : i32
    return %arg0, %c0_i32 : i32, i32
  }
  func.func @transform_1(%arg0: i32) -> (i32, i32) {
    %c0_i32 = arith.constant 0 : i32
    %c0_i32_0 = arith.constant 0 : i32
    %c0_i32_1 = arith.constant 0 : i32
    return %c0_i32, %c0_i32_0 : i32, i32
  }
  func.func @transform_2(%arg0: i32) -> (i32, i32) {
    %c0_i32 = arith.constant 0 : i32
    %c0_i32_0 = arith.constant 0 : i32
    %c0_i32_1 = arith.constant 0 : i32
    return %c0_i32, %c0_i32_0 : i32, i32
  }
  func.func @transform_3(%arg0: i32) -> (i32, i32) {
    %c0_i32 = arith.constant 0 : i32
    %c0_i32_0 = arith.constant 0 : i32
    %c0_i32_1 = arith.constant 0 : i32
    return %c0_i32, %c0_i32_0 : i32, i32
  }
  func.func @transform_4(%arg0: i32) -> (i32, i32) {
    %c0_i32 = arith.constant 0 : i32
    %c0_i32_0 = arith.constant 0 : i32
    %c0_i32_1 = arith.constant 0 : i32
    return %c0_i32, %c0_i32_0 : i32, i32
  }
  func.func @transform_5(%arg0: i32) -> (i32, i32) {
    %c0_i32 = arith.constant 0 : i32
    %c0_i32_0 = arith.constant 0 : i32
    %c0_i32_1 = arith.constant 0 : i32
    return %c0_i32, %c0_i32_0 : i32, i32
  }
  func.func @transform_6(%arg0: i32) -> (i32, i32) {
    %c0_i32 = arith.constant 0 : i32
    %c0_i32_0 = arith.constant 0 : i32
    %c0_i32_1 = arith.constant 0 : i32
    return %c0_i32, %c0_i32_0 : i32, i32
  }
  func.func @transform_7(%arg0: i32) -> (i32, i32) {
    %c0_i32 = arith.constant 0 : i32
    %c0_i32_0 = arith.constant 0 : i32
    return %arg0, %c0_i32 : i32, i32
  }
}

</mosaic_0001>

<bundles_post_ra>
// kernel: waypoint_input_adaptor.1
= control target key start
LH: loop header
LB: loop body
LE: loop exit
PB: predicated region body
PF: predicated region fallthrough
CT: control target
= control target key end

     0   :  { %v530_v3 = vmov 0   ;;  %s782_s0 = inlined_call_operand.vmem [shape: f32[16,2], index: 0, kind: input, shape index: {}]   ;;  %s783_s1 = inlined_call_operand.vmem [shape: f32[2,64], index: 1, kind: input, shape index: {}]   ;;  %s784_s2 = inlined_call_operand.vmem [shape: f32[1,64], index: 2, kind: input, shape index: {}]   ;;  %s785_s3 = inlined_call_operand.vmem [shape: f32[64,128], index: 3, kind: input, shape index: {}]   ;;  %s786_s4 = inlined_call_operand.vmem [shape: f32[1,128], index: 4, kind: input, shape index: {}]   ;;  %s787_s5 = inlined_call_operand.vmem [shape: f32[128,258], index: 5, kind: input, shape index: {}]   ;;  %s788_s6 = inlined_call_operand.vmem [shape: f32[1,258], index: 6, kind: input, shape index: {}]   ;;  %s789_s7 = inlined_call_operand.hbm [shape: f32[16,258], index: 7, kind: output, shape index: {}]  }
   0x1   :  { %v28_v0 = vld [vmem:[%s782_s0 + $0x8] sm:$0xff]  ;;  %v27_v1 = vld [vmem:[%s782_s0] sm:$0xff]  ;;  %v80_v2 = vld [vmem:[%s785_s3 + $0x38] sm:$0xff]  ;;  %506 = vset.pattern.permute.xlu1 %v530_v3  ;;  %504 = vset.pattern.permute.xlu0 %v530_v3 }
   0x2   :  { %37 = vperm.xlu1 %506, %v28_v0   ;;  %32 = vperm.xlu0 %504, %v27_v1   ;;  %v79_v4 = vld [vmem:[%s785_s3 + $0x30] sm:$0xff] }
   0x3   :  { %12 = vsyncpa [#allocation3], 0  ;;  %444 = vmatprep.subr.mxu0 %v80_v2  ;;  %v531_v5 = vmov 1   ;;  %v78_v6 = vld [vmem:[%s785_s3 + $0x28] sm:$0xff]  ;;  %v77_v7 = vld [vmem:[%s785_s3 + $0x20] sm:$0xff]  ;;  %v40_v38 = vlaneseq  ;;  %vm88_vm0 = vcmask 523264  }
   0x4   :  { %445 = vmatpush3.msra.mxu0 %v80_v2  ;;  %v76_v8 = vld [vmem:[%s785_s3 + $0x18] sm:$0xff]  ;;  %v75_v9 = vld [vmem:[%s785_s3 + $0x10] sm:$0xff]  ;;  %v217_v11 = vld [vmem:[%s787_s5 + $0x168] sm:$0xff]  ;;  %vm391_vm1 = vcmask 15360  }
   0x5   :  { %446 = vmatprep.subr.mxu0 %v79_v4  ;;  %v218_v10 = vld [vmem:[%s787_s5 + $0x170] sm:$0xff]  ;;  %v215_v12 = vld [vmem:[%s787_s5 + $0x158] sm:$0xff]  ;;  %v74_v14 = vld [vmem:[%s785_s3 + $0x8] sm:$0xff]  ;;  %v687_v39 = vshrl.u32 %v40_v38, 7 }
   0x6   :  { %507 = vset.pattern.permute.xlu1 %v531_v5  ;;  %505 = vset.pattern.permute.xlu0 %v531_v5  ;;  %v214_v13 = vld [vmem:[%s787_s5 + $0x150] sm:$0xff]  ;;  %v212_v15 = vld [vmem:[%s787_s5 + $0x140] sm:$0xff]  ;;  %v211_v16 = vld [vmem:[%s787_s5 + $0x138] sm:$0xff] }
   0x7   :  { %51 = vperm.xlu1 %507, %v28_v0   ;;  %47 = vperm.xlu0 %505, %v27_v1   ;;  %v73_v17 = vld [vmem:[%s785_s3] sm:$0xff]  ;;  %v209_v18 = vld [vmem:[%s787_s5 + $0x128] sm:$0xff]  ;;  %v633_v20 = vld [vmem:[%s787_s5 + $0x178] sm:$0xff]  ;;  %v42_v40 = vsub.s32 0, %v687_v39  ;;  %v56_v41 = vsub.s32 1, %v687_v39 }
   0x8   :  { %447 = vmatpush3.msra.mxu0 %v79_v4  ;;  %237 = vmatprep.subr.mxu1 %v218_v10  ;;  %v208_v19 = vld [vmem:[%s787_s5 + $0x120] sm:$0xff]  ;;  %v206_v21 = vld [vmem:[%s787_s5 + $0x110] sm:$0xff]  ;;  %v205_v22 = vld [vmem:[%s787_s5 + $0x108] sm:$0xff] }
   0x9   :  { %448 = vmatprep.subr.mxu0 %v78_v6  ;;  %238 = vmatpush1.msra.mxu1 %v217_v11  ;;  %v203_v23 = vld [vmem:[%s787_s5 + $0xf8] sm:$0xff]  ;;  %v202_v24 = vld [vmem:[%s787_s5 + $0xf0] sm:$0xff]  ;;  %v200_v25 = vld [vmem:[%s787_s5 + $0xe0] sm:$0xff] }
   0xa   :  { %449 = vmatpush3.msra.mxu0 %v78_v6  ;;  %239 = vmatprep.subr.mxu1 %v215_v12  ;;  %v199_v26 = vld [vmem:[%s787_s5 + $0xd8] sm:$0xff]  ;;  %v197_v27 = vld [vmem:[%s787_s5 + $0xc8] sm:$0xff]  ;;  %v196_v28 = vld [vmem:[%s787_s5 + $0xc0] sm:$0xff] }
   0xb   :  { %450 = vmatprep.subr.mxu0 %v77_v7  ;;  %240 = vmatpush1.msra.mxu1 %v214_v13  ;;  %v194_v29 = vld [vmem:[%s787_s5 + $0xb0] sm:$0xff]  ;;  %v193_v30 = vld [vmem:[%s787_s5 + $0xa8] sm:$0xff]  ;;  %v191_v31 = vld [vmem:[%s787_s5 + $0x98] sm:$0xff] }
   0xc   :  { %451 = vmatpush3.msra.mxu0 %v77_v7  ;;  %241 = vmatprep.subr.mxu1 %v212_v15  ;;  %v190_v32 = vld [vmem:[%s787_s5 + $0x90] sm:$0xff]  ;;  %v188_v33 = vld [vmem:[%s787_s5 + $0x80] sm:$0xff]  ;;  %v187_v34 = vld [vmem:[%s787_s5 + $0x78] sm:$0xff] }
   0xd   :  { %452 = vmatprep.subr.mxu0 %v76_v8  ;;  %242 = vmatpush1.msra.mxu1 %v211_v16  ;;  %v185_v35 = vld [vmem:[%s787_s5 + $0x68] sm:$0xff]  ;;  %v184_v36 = vld [vmem:[%s787_s5 + $0x60] sm:$0xff]  ;;  %v182_v37 = vld [vmem:[%s787_s5 + $0x50] sm:$0xff] }
   0xe   :  { %453 = vmatpush3.msra.mxu0 %v76_v8  ;;  %243 = vmatprep.subr.mxu1 %v209_v18  ;;  %v29_v42 = vld [vmem:[%s783_s1] sm:$0x3]  ;;  %v213_v61 = vld [vmem:[%s787_s5 + $0x148] sm:$0xff]  ;;  %v210_v62 = vld [vmem:[%s787_s5 + $0x130] sm:$0xff]  ;;  %v532_v18 = vmov 0.0  }
   0xf   :  { %454 = vmatprep.subr.mxu0 %v75_v9  ;;  %244 = vmatpush1.msra.mxu1 %v208_v19  ;;  %v43_v45 = vrot.slane %v29_v42, %v42_v40  ;;  %v57_v46 = vrot.slane %v29_v42, %v56_v41  ;;  %v412_v53 = vld [vmem:[%s784_s2] ss:$0 sm:$0xff]  ;;  %v207_v63 = vld [vmem:[%s787_s5 + $0x118] sm:$0xff]  ;;  %v201_v1 = vld [vmem:[%s787_s5 + $0xe8] sm:$0xff] }
  0x10   :  { %455 = vmatpush3.msra.mxu0 %v75_v9  ;;  %245 = vmatprep.subr.mxu1 %v206_v21  ;;  %v216_v60 = vld [vmem:[%s787_s5 + $0x160] sm:$0xff]  ;;  %v198_v2 = vld [vmem:[%s787_s5 + $0xd0] sm:$0xff]  ;;  %v195_v3 = vld [vmem:[%s787_s5 + $0xb8] sm:$0xff] }
  0x11   :  { %456 = vmatprep.subr.mxu0 %v74_v14  ;;  %246 = vmatpush1.msra.mxu1 %v205_v22  ;;  %v204_v0 = vld [vmem:[%s787_s5 + $0x100] sm:$0xff]  ;;  %v189_v5 = vld [vmem:[%s787_s5 + $0x88] sm:$0xff]  ;;  %v186_v6 = vld [vmem:[%s787_s5 + $0x70] sm:$0xff] }
  0x12   :  { %457 = vmatpush3.msra.mxu0 %v74_v14  ;;  %247 = vmatprep.subr.mxu1 %v203_v23  ;;  %v192_v4 = vld [vmem:[%s787_s5 + $0xa0] sm:$0xff]  ;;  %v181_v7 = vld [vmem:[%s787_s5 + $0x48] sm:$0xff]  ;;  %v183_v8 = vld [vmem:[%s787_s5 + $0x58] sm:$0xff] }
  0x13   :  { %458 = vmatprep.subr.mxu0 %v73_v17  ;;  %248 = vmatpush1.msra.mxu1 %v202_v24  ;;  %v179_v9 = vld [vmem:[%s787_s5 + $0x38] sm:$0xff]  ;;  %v178_v10 = vld [vmem:[%s787_s5 + $0x30] sm:$0xff]  ;;  %v180_v11 = vld [vmem:[%s787_s5 + $0x40] sm:$0xff] }
  0x14   :  { %459 = vmatpush3.msra.mxu0 %v73_v17  ;;  %249 = vmatprep.subr.mxu1 %v200_v25  ;;  %v176_v12 = vld [vmem:[%s787_s5 + $0x20] sm:$0xff]  ;;  %v175_v13 = vld [vmem:[%s787_s5 + $0x18] sm:$0xff]  ;;  %v177_v14 = vld [vmem:[%s787_s5 + $0x28] sm:$0xff] }
  0x15   :  { %463 = vmatprep.subr.mxu0 %v633_v20  ;;  %250 = vmatpush1.msra.mxu1 %v199_v26  ;;  %v173_v15 = vld [vmem:[%s787_s5 + $0x8] sm:$0xff]  ;;  %v172_v16 = vld [vmem:[%s787_s5] sm:$0xff]  ;;  %v174_v17 = vld [vmem:[%s787_s5 + $0x10] sm:$0xff] }
  0x16   :  { %251 = vmatprep.subr.mxu1 %v197_v27  ;;  %301 = vmatprep.mubr.f32.mxu1 %v532_v18  ;;  %v413_v19 = vld [vmem:[%s786_s4] ss:$0 sm:$0xff]  ;;  %v232_v27 = vsub.s32 2, %v687_v39  ;;  %s533_s4 = smov [#allocation2]  }
  0x17   :  { %252 = vmatpush1.msra.mxu1 %v196_v28  ;;  %v220_v26 = vld [vmem:[%s788_s6] sm:$0x7]  ;;  %s401_s6 = sshll.u32 %s533_s4, 4  ;;  %s402_s6 = int_to_ptr.vmem [resolvable:$true] %s401_s6 }
  0x18   :  { %253 = vmatprep.subr.mxu1 %v194_v29  ;;  %v225_v28 = vrot.slane %v220_v26, %v42_v40  ;;  %v233_v29 = vrot.slane %v220_v26, %v232_v27  ;;  %s508_s19 = scalar_lea.vmem %s402_s6, 768  ;;  %p513_p1 = scmp.lt.s32.totalorder %s402_s6, %s402_s6 }
  0x19   :  { %254 = vmatpush1.msra.mxu1 %v193_v30  ;;  %v229_v30 = vrot.slane %v220_v26, %v56_v41  ;;  %p509_p0 = scmp.ne.s32.totalorder %s402_s6, %s508_s19  ;;  %p514_p2 = scmp.lt.s32.totalorder %s508_s19, %s508_s19 }
  0x1a   :  { %255 = vmatprep.subr.mxu1 %v191_v31 }
  0x1b   :  { %256 = vmatpush1.msra.mxu1 %v190_v32  ;;  %p515_p3 = por %p514_p2, %p513_p1 }
  0x1c   :  { %257 = vmatprep.subr.mxu1 %v188_v33 }
  0x1d   :  { %258 = vmatpush1.msra.mxu1 %v187_v34  ;;  %p516_p4 = pnand %p515_p3, %p509_p0 }
  0x1e   :  { %259 = vmatprep.subr.mxu1 %v185_v35 }
  0x1f   :  { %260 = vmatpush1.msra.mxu1 %v184_v36 }
  0x20   :  { %261 = vmatprep.subr.mxu1 %v182_v37 }
  0x21   :  { %262 = vmatpush1.msra.mxu1 %v181_v7 }
  0x22   :  { %263 = vmatprep.subr.mxu1 %v179_v9 }
  0x23   :  { %264 = vmatpush1.msra.mxu1 %v178_v10 }
  0x24   :  { %265 = vmatprep.subr.mxu1 %v176_v12 }
  0x25   :  { %266 = vmatpush1.msra.mxu1 %v175_v13 }
  0x26   :  { %267 = vmatprep.subr.mxu1 %v173_v15 }
  0x27   :  { %268 = vmatpush1.msra.mxu1 %v172_v16 }
  0x7d   :  { %v33_v43 = vpop.permute.xlu0 %32  ;;  %v38_v44 = vpop.permute.xlu1 %37 }
  0x7e   :  { %v44_v49 = vmul.f32 %v43_v45, %v33_v43  ;;  %v45_v50 = vmul.f32 %v43_v45, %v38_v44 }
  0x82   :  { %v52_v47 = vpop.permute.xlu1 %51  ;;  %v48_v48 = vpop.permute.xlu0 %47 }
  0x83   :  { %v59_v51 = vmul.f32 %v57_v46, %v52_v47  ;;  %v58_v52 = vmul.f32 %v57_v46, %v48_v48 }
  0x85   :  { %v61_v54 = vadd.f32 %v59_v51, %v45_v50  ;;  %v60_v55 = vadd.f32 %v58_v52, %v44_v49 }
  0x87   :  { %v69_v56 = vadd.f32 %v412_v53, %v60_v55  ;;  %v70_v57 = vadd.f32 %v412_v53, %v61_v54 }
  0x89   :  { %v71_v58 = vmax.f32 %v69_v56, 0.0  ;;  %v72_v59 = vmax.f32 %v70_v57, 0.0 }
  0x8b   :  { %460 = vmatprep.mubr.msk.f32.mxu0 %vm88_vm0, %v71_v58 }
  0x8c   :  { %461 = vmatmul.mubr.msk.f32.vlgmr.msra.gmra.mxu0 %vm88_vm0, %v72_v59 }
  0x8d   :  { %464 = vmatpush3.msra.mxu0 %v633_v20 }
  0x8e   :  { %465 = vmatprep.subr.mxu0 %v216_v60 }
  0x8f   :  { %466 = vmatpush3.msra.mxu0 %v216_v60 }
  0x90   :  { %467 = vmatprep.subr.mxu0 %v213_v61 }
  0x91   :  { %468 = vmatpush3.msra.mxu0 %v213_v61 }
  0x92   :  { %469 = vmatprep.subr.mxu0 %v210_v62 }
  0x93   :  { %470 = vmatpush3.msra.mxu0 %v210_v62 }
  0x94   :  { %471 = vmatprep.subr.mxu0 %v207_v63 }
  0x95   :  { %472 = vmatpush3.msra.mxu0 %v207_v63 }
  0x96   :  { %473 = vmatprep.subr.mxu0 %v204_v0 }
  0x97   :  { %474 = vmatpush3.msra.mxu0 %v204_v0 }
  0x98   :  { %475 = vmatprep.subr.mxu0 %v201_v1 }
  0x99   :  { %476 = vmatpush3.msra.mxu0 %v201_v1 }
  0x9a   :  { %477 = vmatprep.subr.mxu0 %v198_v2 }
  0x9b   :  { %478 = vmatpush3.msra.mxu0 %v198_v2 }
  0x9c   :  { %479 = vmatprep.subr.mxu0 %v195_v3 }
  0x9d   :  { %480 = vmatpush3.msra.mxu0 %v195_v3 }
  0x9e   :  { %481 = vmatprep.subr.mxu0 %v192_v4 }
  0x9f   :  { %482 = vmatpush3.msra.mxu0 %v192_v4 }
  0xa0   :  { %483 = vmatprep.subr.mxu0 %v189_v5 }
  0xa1   :  { %484 = vmatpush3.msra.mxu0 %v189_v5 }
  0xa2   :  { %485 = vmatprep.subr.mxu0 %v186_v6 }
  0xa3   :  { %486 = vmatpush3.msra.mxu0 %v186_v6 }
  0xa4   :  { %487 = vmatprep.subr.mxu0 %v183_v8 }
  0xa5   :  { %488 = vmatpush3.msra.mxu0 %v183_v8 }
  0xa6   :  { %489 = vmatprep.subr.mxu0 %v180_v11 }
  0xa7   :  { %490 = vmatpush3.msra.mxu0 %v180_v11 }
  0xa8   :  { %491 = vmatprep.subr.mxu0 %v177_v14 }
  0xa9   :  { %492 = vmatpush3.msra.mxu0 %v177_v14 }
  0xaa   :  { %493 = vmatprep.subr.mxu0 %v174_v17 }
  0xab   :  { %494 = vmatpush3.msra.mxu0 %v174_v17 }
 0x14c   :  { %v462_v20 = vpop.f32.mrf.mxu0 }
 0x14d   :  { %v167_v21 = vadd.f32 %v462_v20, %v413_v19 }
 0x14e   :  { %v161_v22 = vpop.f32.mrf.mxu0 }
 0x14f   :  { %v162_v23 = vadd.f32 %v413_v19, %v161_v22  ;;  %v171_v25 = vmax.f32 %v167_v21, 0.0 }
 0x151   :  { %v170_v24 = vmax.f32 %v162_v23, 0.0 }
 0x153   :  { %302 = vmatmul.mubr.f32.vlgmr.msra.gmra.mxu1 %v170_v24  ;;  %495 = vmatprep.mubr.f32.mxu0 %v170_v24 }
 0x154   :  { %496 = vmatmul.mubr.f32.vlgmr.msra.gmra.mxu0 %v171_v25  ;;  %307 = vmatprep.mubr.f32.mxu1 %v532_v18 }
 0x157   :  { %308 = vmatmul.mubr.f32.gmra.mxu1 %v171_v25 }
 0x213   :  { %v303_v31 = vpop.f32.mrf.mxu1 }
 0x214   :  { %v304_v32 = vadd.f32 %v303_v31, %v225_v28  ;;  %v497_v33 = vpop.f32.mrf.mxu0 }
 0x215   :  { %v386_v34 = vadd.f32 %v497_v33, %v233_v29  ;;  %v305_v35 = vpop.f32.mrf.mxu1 }
 0x216   :  { %389 = vst [vmem:[#allocation2] sm:$0xff] %v304_v32  ;;  %v306_v36 = vadd.f32 %v305_v35, %v229_v30  ;;  %v380_v37 = vpop.f32.mrf.mxu0 }
 0x217   :  { %395 = vst.msk [vmem:[#allocation2 + $0x28] sm:$0xff] %vm391_vm1, %v386_v34  ;;  %v381_v38 = vadd.f32 %v380_v37, %v233_v29  ;;  %v309_v42 = vpop.f32.mrf.mxu1 }
 0x218   :  { %390 = vst [vmem:[#allocation2 + $0x8] sm:$0xff] %v306_v36  ;;  %v310_v40 = vadd.f32 %v309_v42, %v225_v28 }
 0x219   :  { %392 = vst.msk [vmem:[#allocation2 + $0x10] sm:$0xff] %vm391_vm1, %v381_v38  ;;  %v311_v43 = vpop.f32.mrf.mxu1 }
 0x21a   :  { %393 = vst [vmem:[#allocation2 + $0x18] sm:$0xff] %v310_v40  ;;  %v312_v39 = vadd.f32 %v311_v43, %v229_v30 }
 0x21c   :  { %394 = vst [vmem:[#allocation2 + $0x20] sm:$0xff] %v312_v39 }
 0x21d   :  { %519 = shalt.err (!%p516_p4)
}
 0x21e   :  { %s534_s20 = smov 384   ;;  %s535_s21 = smov 24  }
 0x21f   :  { %407 = dma.vmem_to_hbm [thread:$0]  %s402_s6, 768, %s789_s7, [#allocation3], %s534_s20, %s534_s20, %s535_s21  }
 0x220   :  { %528 = dma.done.wait [#allocation3], 768  }
 0x221   :  { %529 = vsyncadd [#allocation3], 4294966528 }
 0x222   :  { %411 = vsyncpa [#allocation3], 1 }

</bundles_post_ra>
